<compile_context>
chip_gen: v7x
topology: tpu7x:2x2x1
jax: 0.10.0
libtpu: 0.0.40
codegen_flags: <defaults>
</compile_context>

<pallas_src>
import functools

import jax
import jax.numpy as jnp
from jax.experimental import pallas as pl
from jax.experimental.pallas import tpu as pltpu

EPS = 1e-12      # F.normalize eps (clamp applied to the L2 norm)
NEG = -1e30      # large finite stand-in for -inf on masked logits


def _round_up(x: int, m: int) -> int:
    return (x + m - 1) // m * m


def _ntxent_kernel(rep_ref, pos_ref, out_ref, *, n, n_pad, use_max, exp_dtype):
    """One query-row tile: two wide matmuls + masked LSE -> partial loss sum."""
    tq = pos_ref.shape[0]
    two_n_pad = 2 * n_pad
    row_off = pl.multiple_of(pl.program_id(0) * tq, 8)

    # Per-row positive logit (f32, already includes the 1/temperature factor,
    # precomputed once in the wrapper — exact for both MXU dtypes).
    pos = pos_ref[...]                                           # (tq, 1)

    # Mask building blocks shared by both row-halves (built once per step).
    col = jax.lax.broadcasted_iota(jnp.int32, (tq, two_n_pad), 1)
    row = jax.lax.broadcasted_iota(jnp.int32, (tq, two_n_pad), 0)
    col_invalid = ((col >= n) & (col < n_pad)) | (col >= n_pad + n)
    neg = jnp.float32(NEG)

    keys = rep_ref[...]                                          # (2*n_pad, d_pad)

    def half_lse(q_start, diag_off):
        # (tq, d) x (2*n_pad, d), contracting the last dims -> (tq, 2*n_pad);
        # no transpose, f32 accumulation on the MXU.
        q = rep_ref[pl.ds(pl.multiple_of(q_start, 8), tq), :]
        sim = jax.lax.dot_general(q, keys, (((1,), (1,)), ((), ())),
                                  preferred_element_type=jnp.float32)
        # Mask self-similarity diagonal and padded key columns (finite NEG so
        # exp underflows to exactly 0).
        sim = jnp.where((col == row + diag_off) | col_invalid, neg, sim)
        if use_max:                       # only for extreme temperatures
            m = jnp.max(sim, axis=-1, keepdims=True)
            e = jnp.exp((sim - m).astype(exp_dtype)).astype(jnp.float32)
            return jnp.log(jnp.sum(e, axis=-1, keepdims=True)) + m
        # Max-free LSE: valid logits are in [-1/T, 1/T] after normalization.
        e = jnp.exp(sim.astype(exp_dtype)).astype(jnp.float32)
        return jnp.log(jnp.sum(e, axis=-1, keepdims=True))

    # Process the two halves sequentially so only one (tq, 2*n_pad) f32 sim
    # block is live at a time (bounds VMEM/vreg pressure at large tiles).
    lse_i = half_lse(row_off, row_off)                   # query rows from z_i
    lse_j = half_lse(n_pad + row_off, n_pad + row_off)   # query rows from z_j

    # Zero the contribution of padded query rows.
    row_idx = jax.lax.broadcasted_iota(jnp.int32, (tq, 1), 0) + row_off
    rvalid = (row_idx < n).astype(jnp.float32)
    tile_sum = jnp.sum(rvalid * (lse_i + lse_j - 2.0 * pos))

    # Lane-dense per-tile partial sum: scalar at [0, 0], zeros elsewhere.
    # (No shared accumulator -> grid axis can be "parallel" for v7x megacore.)
    r8 = jax.lax.broadcasted_iota(jnp.int32, (8, 128), 0)
    c8 = jax.lax.broadcasted_iota(jnp.int32, (8, 128), 1)
    out_ref[...] = jnp.where((r8 == 0) & (c8 == 0), tile_sum, 0.0)


def ntxent_loss(z_i: jax.Array, z_j: jax.Array, *,
                temperature: float = 0.5,
                matmul_dtype=jnp.bfloat16,
                exp_dtype=jnp.float32,          # bf16 exp is ~2x EUP on v6e/v7x
                tq: int | None = None) -> jax.Array:
    n, d = z_i.shape
    assert z_j.shape == (n, d)

    # --- One-time O(N*D) wrapper work (hoisted out of the kernel grid loop):
    # L2-normalize, fold 1/sqrt(T) into the operands, compute the per-row
    # positive logit in f32, and cast the keys to the MXU dtype.
    scale = jnp.float32((1.0 / float(temperature)) ** 0.5)

    def _norm_scale(x):
        x = x.astype(jnp.float32)
        ss = jnp.sum(x * x, axis=-1, keepdims=True)
        return x * (jax.lax.rsqrt(jnp.maximum(ss, jnp.float32(EPS * EPS))) * scale)

    zi_n = _norm_scale(z_i)
    zj_n = _norm_scale(z_j)
    pos = jnp.sum(zi_n * zj_n, axis=-1, keepdims=True)     # (n, 1), includes 1/T

    if tq is None:
        tq = 256                      # fills the 2x256x256 MXU on v6e/v7x
    tq = max(8, _round_up(min(int(tq), _round_up(n, 8)), 8))
    n_pad = _round_up(n, tq)
    d_pad = _round_up(d, 128)         # lane-dense MXU contraction dim
    num_tiles = n_pad // tq

    # Resident key matrix [z_i_n ; z_j_n]; padded rows are exactly zero.
    rep = jnp.zeros((2 * n_pad, d_pad), jnp.float32)
    rep = rep.at[:n, :d].set(zi_n).at[n_pad:n_pad + n, :d].set(zj_n)
    rep = rep.astype(matmul_dtype)
    pos_p = jnp.zeros((n_pad, 1), jnp.float32).at[:n].set(pos)

    # With L2-normalized rows every valid logit is bounded by 1/temperature,
    # so the LSE max-pass is only needed for extreme temperatures.
    use_max = (1.0 / float(temperature)) > 30.0

    kernel = functools.partial(_ntxent_kernel, n=n, n_pad=n_pad,
                               use_max=use_max, exp_dtype=exp_dtype)

    def _call(key_spec):
        return pl.pallas_call(
            kernel,
            out_shape=jax.ShapeDtypeStruct((num_tiles * 8, 128), jnp.float32),
            grid=(num_tiles,),
            in_specs=[
                key_spec,                                     # resident keys
                pl.BlockSpec((tq, 1), lambda i: (i, 0)),      # positive logits
            ],
            out_specs=pl.BlockSpec((8, 128), lambda i: (i, 0)),
            compiler_params=pltpu.CompilerParams(
                # Per-tile partial sums -> no cross-step state, so tiles can
                # be sharded across v7x's two TensorCores.
                dimension_semantics=("parallel",),
                # Leave headroom on v7x (64 MiB physical VMEM per core).
                vmem_limit_bytes=48 * 1024 * 1024,
            ),
        )(rep, pos_p)

    key_shape = (2 * n_pad, d_pad)
    try:
        # Constant index_map -> the key block is fetched once; single-buffer
        # it so the resident footprint is not doubled.
        partials = _call(pl.BlockSpec(key_shape, lambda i: (0, 0),
                                      pipeline_mode=pl.Buffered(1)))
    except Exception:
        # Fallback for JAX builds that reject single-buffered resident blocks
        # (correctness is unchanged; only key-VMEM footprint differs).
        partials = _call(pl.BlockSpec(key_shape, lambda i: (0, 0)))

    return jnp.sum(partials) / jnp.float32(2 * n)


def _reference_ntxent(z_i, z_j, temperature=0.5):
    """Pure-JAX f32 reference mirroring the PyTorch module exactly."""
    n = z_i.shape[0]
    zi = z_i / jnp.maximum(jnp.linalg.norm(z_i, axis=1, keepdims=True), EPS)
    zj = z_j / jnp.maximum(jnp.linalg.norm(z_j, axis=1, keepdims=True), EPS)
    rep = jnp.concatenate([zi, zj], axis=0)
    sim = jnp.matmul(rep, rep.T, precision=jax.lax.Precision.HIGHEST)
    sim = jnp.where(jnp.eye(2 * n, dtype=bool), -jnp.inf, sim) / temperature
    labels = jnp.concatenate([jnp.arange(n) + n, jnp.arange(n)])
    logp = jax.nn.log_softmax(sim, axis=-1)
    return -jnp.mean(logp[jnp.arange(2 * n), labels])


if __name__ == "__main__":
    key = jax.random.PRNGKey(0)
    k1, k2, k3, k4 = jax.random.split(key, 4)

    # Small shapes implied by the module's forward: (N, D) projected features.
    N, D = 8, 32
    z_i = jax.random.normal(k1, (N, D), dtype=jnp.float32)
    z_j = jax.random.normal(k2, (N, D), dtype=jnp.float32)
    ref = _reference_ntxent(z_i, z_j)

    # f32 MXU path.  Tolerances allow for DEFAULT-precision (bf16-pass) MXU
    # lowerings while still catching any structural/masking/scale error.
    loss_f32 = jax.block_until_ready(ntxent_loss(z_i, z_j, matmul_dtype=jnp.float32))
    assert jnp.allclose(loss_f32, ref, atol=2e-2, rtol=1e-2), (loss_f32, ref)

    # Default bf16-MXU path (f32 accumulation).
    loss_bf16 = jax.block_until_ready(ntxent_loss(z_i, z_j))
    assert jnp.allclose(loss_bf16, ref, atol=3e-2, rtol=1e-2), (loss_bf16, ref)

    # bf16-exp variant (EUP headroom on v6e/v7x); looser tolerance.
    loss_bf16e = jax.block_until_ready(ntxent_loss(z_i, z_j, exp_dtype=jnp.bfloat16))
    assert jnp.allclose(loss_bf16e, ref, atol=6e-2, rtol=2e-2), (loss_bf16e, ref)

    # Multi-tile + padded path (N not a multiple of the tile, D < 128).
    N2, D2 = 203, 48
    z_i2 = jax.random.normal(k3, (N2, D2), dtype=jnp.float32)
    z_j2 = jax.random.normal(k4, (N2, D2), dtype=jnp.float32)
    ref2 = _reference_ntxent(z_i2, z_j2)
    loss2 = jax.block_until_ready(
        ntxent_loss(z_i2, z_j2, matmul_dtype=jnp.float32, tq=64))
    assert jnp.allclose(loss2, ref2, atol=2e-2, rtol=1e-2), (loss2, ref2)

    print("KERNEL_OK")
</pallas_src>

<mosaic_0001>
module attributes {stable_mosaic.version = 11 : i64} {
  func.func @_ntxent_kernel(%arg0: i32, %arg1: memref<16x128xf32, #tpu.memory_space<vmem>>, %arg2: memref<8x1xf32, #tpu.memory_space<vmem>>, %arg3: memref<8x128xf32, #tpu.memory_space<vmem>>) attributes {dimension_semantics = [#tpu.dimension_semantics<parallel>], iteration_bounds = array<i64: 1>, scalar_prefetch = 0 : i64, scratch_operands = 0 : i64, tpu.core_type = #tpu.core_type<tc>, window_params = [{pipeline_mode = #tpu.pipeline_mode<synchronous>, transform_indices = @transform_0, window_bounds = array<i64: 16, 128>}, {transform_indices = @transform_1, window_bounds = array<i64: 8, 1>}, {transform_indices = @transform_2, window_bounds = array<i64: 8, 128>}]} {
    %c8_i32 = arith.constant 8 : i32
    %0 = arith.muli %arg0, %c8_i32 : i32
    %1 = tpu.assume_multiple %0, 8 : i32
    %c0 = arith.constant 0 : index
    %c0_0 = arith.constant 0 : index
    %2 = vector.load %arg2[%c0, %c0_0] : memref<8x1xf32, #tpu.memory_space<vmem>>, vector<8x1xf32>
    %3 = tpu.iota {dimensions = array<i32: 1>} : vector<8x16xi32>
    %4 = tpu.iota {dimensions = array<i32: 0>} : vector<8x16xi32>
    %c8_i32_1 = arith.constant 8 : i32
    %5 = vector.broadcast %c8_i32_1 : i32 to vector<8x16xi32>
    %6 = arith.cmpi sge, %3, %5 : vector<8x16xi32>
    %c8_i32_2 = arith.constant 8 : i32
    %7 = vector.broadcast %c8_i32_2 : i32 to vector<8x16xi32>
    %8 = arith.cmpi slt, %3, %7 : vector<8x16xi32>
    %9 = arith.andi %6, %8 : vector<8x16xi1>
    %c16_i32 = arith.constant 16 : i32
    %10 = vector.broadcast %c16_i32 : i32 to vector<8x16xi32>
    %11 = arith.cmpi sge, %3, %10 : vector<8x16xi32>
    %12 = arith.ori %9, %11 : vector<8x16xi1>
    %c0_3 = arith.constant 0 : index
    %c0_4 = arith.constant 0 : index
    %13 = vector.load %arg1[%c0_3, %c0_4] : memref<16x128xf32, #tpu.memory_space<vmem>>, vector<16x128xf32>
    %14 = tpu.assume_multiple %1, 8 : i32
    %15 = arith.index_cast %14 : i32 to index
    %c0_5 = arith.constant 0 : index
    %16 = vector.load %arg1[%15, %c0_5] : memref<16x128xf32, #tpu.memory_space<vmem>>, vector<8x128xf32>
    %cst = arith.constant dense<0.000000e+00> : vector<8x16xf32>
    %17 = tpu.matmul %16, %13, %cst {dimension_numbers = #tpu.dot_dimension_numbers<[1], [1], [0], [0], [0, 0, 1, 0], [], []>} : vector<8x128xf32>, vector<16x128xf32>, vector<8x16xf32> -> vector<8x16xf32>
    %18 = vector.broadcast %1 : i32 to vector<8x16xi32>
    %19 = arith.addi %4, %18 : vector<8x16xi32>
    %20 = arith.cmpi eq, %3, %19 : vector<8x16xi32>
    %21 = arith.ori %20, %12 : vector<8x16xi1>
    %cst_6 = arith.constant -1.000000e+30 : f32
    %22 = vector.broadcast %cst_6 : f32 to vector<8x16xf32>
    %23 = arith.select %21, %22, %17 : vector<8x16xi1>, vector<8x16xf32>
    %24 = math.exp %23 : vector<8x16xf32>
    %cst_7 = arith.constant dense<0.000000e+00> : vector<8xf32>
    %25 = vector.multi_reduction <add>, %24, %cst_7 [1] : vector<8x16xf32> to vector<8xf32>
    %26 = vector.shape_cast %25 : vector<8xf32> to vector<8x1xf32>
    %27 = math.log %26 : vector<8x1xf32>
    %c8_i32_8 = arith.constant 8 : i32
    %28 = arith.addi %c8_i32_8, %1 : i32
    %c8_i32_9 = arith.constant 8 : i32
    %29 = arith.addi %c8_i32_9, %1 : i32
    %30 = tpu.assume_multiple %28, 8 : i32
    %31 = arith.index_cast %30 : i32 to index
    %c0_10 = arith.constant 0 : index
    %32 = vector.load %arg1[%31, %c0_10] : memref<16x128xf32, #tpu.memory_space<vmem>>, vector<8x128xf32>
    %cst_11 = arith.constant dense<0.000000e+00> : vector<8x16xf32>
    %33 = tpu.matmul %32, %13, %cst_11 {dimension_numbers = #tpu.dot_dimension_numbers<[1], [1], [0], [0], [0, 0, 1, 0], [], []>} : vector<8x128xf32>, vector<16x128xf32>, vector<8x16xf32> -> vector<8x16xf32>
    %34 = vector.broadcast %29 : i32 to vector<8x16xi32>
    %35 = arith.addi %4, %34 : vector<8x16xi32>
    %36 = arith.cmpi eq, %3, %35 : vector<8x16xi32>
    %37 = arith.ori %36, %12 : vector<8x16xi1>
    %cst_12 = arith.constant -1.000000e+30 : f32
    %38 = vector.broadcast %cst_12 : f32 to vector<8x16xf32>
    %39 = arith.select %37, %38, %33 : vector<8x16xi1>, vector<8x16xf32>
    %40 = math.exp %39 : vector<8x16xf32>
    %cst_13 = arith.constant dense<0.000000e+00> : vector<8xf32>
    %41 = vector.multi_reduction <add>, %40, %cst_13 [1] : vector<8x16xf32> to vector<8xf32>
    %42 = vector.shape_cast %41 : vector<8xf32> to vector<8x1xf32>
    %43 = math.log %42 : vector<8x1xf32>
    %44 = tpu.iota {dimensions = array<i32: 0>} : vector<8x1xi32>
    %45 = vector.broadcast %1 : i32 to vector<8x1xi32>
    %46 = arith.addi %44, %45 : vector<8x1xi32>
    %c8_i32_14 = arith.constant 8 : i32
    %47 = vector.broadcast %c8_i32_14 : i32 to vector<8x1xi32>
    %48 = arith.cmpi slt, %46, %47 : vector<8x1xi32>
    %49 = arith.extui %48 : vector<8x1xi1> to vector<8x1xi32>
    %50 = arith.sitofp %49 : vector<8x1xi32> to vector<8x1xf32>
    %51 = arith.addf %27, %43 : vector<8x1xf32>
    %cst_15 = arith.constant 2.000000e+00 : f32
    %52 = vector.broadcast %cst_15 : f32 to vector<8x1xf32>
    %53 = arith.mulf %52, %2 : vector<8x1xf32>
    %54 = arith.subf %51, %53 : vector<8x1xf32>
    %55 = arith.mulf %50, %54 : vector<8x1xf32>
    %56 = vector.shape_cast %55 : vector<8x1xf32> to vector<1x8x1xf32>
    %cst_16 = arith.constant dense<0.000000e+00> : vector<1xf32>
    %57 = vector.multi_reduction <add>, %56, %cst_16 [1, 2] : vector<1x8x1xf32> to vector<1xf32>
    %58 = vector.shape_cast %57 : vector<1xf32> to vector<1x1x1xf32>
    %59 = vector.extract %58[0, 0, 0] : f32 from vector<1x1x1xf32>
    %60 = tpu.iota {dimensions = array<i32: 0>} : vector<8x128xi32>
    %61 = tpu.iota {dimensions = array<i32: 1>} : vector<8x128xi32>
    %c0_i32 = arith.constant 0 : i32
    %62 = vector.broadcast %c0_i32 : i32 to vector<8x128xi32>
    %63 = arith.cmpi eq, %60, %62 : vector<8x128xi32>
    %c0_i32_17 = arith.constant 0 : i32
    %64 = vector.broadcast %c0_i32_17 : i32 to vector<8x128xi32>
    %65 = arith.cmpi eq, %61, %64 : vector<8x128xi32>
    %66 = arith.andi %63, %65 : vector<8x128xi1>
    %cst_18 = arith.constant 0.000000e+00 : f32
    %67 = vector.broadcast %59 : f32 to vector<8x128xf32>
    %68 = vector.broadcast %cst_18 : f32 to vector<8x128xf32>
    %69 = arith.select %66, %67, %68 : vector<8x128xi1>, vector<8x128xf32>
    %c0_19 = arith.constant 0 : index
    %c0_20 = arith.constant 0 : index
    %70 = vector.load %arg3[%c0_19, %c0_20] : memref<8x128xf32, #tpu.memory_space<vmem>>, vector<8x128xf32>
    tpu.vector_store %arg3[%c0_19, %c0_20], %69 {strides = array<i32>} : memref<8x128xf32, #tpu.memory_space<vmem>>, vector<8x128xf32>,
    return
  }
  func.func @transform_0(%arg0: i32) -> (i32, i32) {
    %c0_i32 = arith.constant 0 : i32
    %c0_i32_0 = arith.constant 0 : i32
    %c0_i32_1 = arith.constant 0 : i32
    return %c0_i32, %c0_i32_0 : i32, i32
  }
  func.func @transform_1(%arg0: i32) -> (i32, i32) {
    %c0_i32 = arith.constant 0 : i32
    %c0_i32_0 = arith.constant 0 : i32
    return %arg0, %c0_i32 : i32, i32
  }
  func.func @transform_2(%arg0: i32) -> (i32, i32) {
    %c0_i32 = arith.constant 0 : i32
    %c0_i32_0 = arith.constant 0 : i32
    return %arg0, %c0_i32 : i32, i32
  }
}

module attributes {stable_mosaic.version = 11 : i64} {
  func.func @_ntxent_kernel(%arg0: i32, %arg1: memref<16x128xf32, #tpu.memory_space<vmem>>, %arg2: memref<8x1xf32, #tpu.memory_space<vmem>>, %arg3: memref<8x128xf32, #tpu.memory_space<vmem>>) attributes {dimension_semantics = [#tpu.dimension_semantics<parallel>], iteration_bounds = array<i64: 1>, scalar_prefetch = 0 : i64, scratch_operands = 0 : i64, tpu.core_type = #tpu.core_type<tc>, window_params = [{pipeline_mode = #tpu.pipeline_mode<synchronous>, transform_indices = @transform_0, window_bounds = array<i64: 16, 128>}, {transform_indices = @transform_1, window_bounds = array<i64: 8, 1>}, {transform_indices = @transform_2, window_bounds = array<i64: 8, 128>}]} {
    %c8_i32 = arith.constant 8 : i32
    %0 = arith.muli %arg0, %c8_i32 : i32
    %1 = tpu.assume_multiple %0, 8 : i32
    %c0 = arith.constant 0 : index
    %c0_0 = arith.constant 0 : index
    %2 = vector.load %arg2[%c0, %c0_0] : memref<8x1xf32, #tpu.memory_space<vmem>>, vector<8x1xf32>
    %3 = tpu.iota {dimensions = array<i32: 1>} : vector<8x16xi32>
    %4 = tpu.iota {dimensions = array<i32: 0>} : vector<8x16xi32>
    %c8_i32_1 = arith.constant 8 : i32
    %5 = vector.broadcast %c8_i32_1 : i32 to vector<8x16xi32>
    %6 = arith.cmpi sge, %3, %5 : vector<8x16xi32>
    %c8_i32_2 = arith.constant 8 : i32
    %7 = vector.broadcast %c8_i32_2 : i32 to vector<8x16xi32>
    %8 = arith.cmpi slt, %3, %7 : vector<8x16xi32>
    %9 = arith.andi %6, %8 : vector<8x16xi1>
    %c16_i32 = arith.constant 16 : i32
    %10 = vector.broadcast %c16_i32 : i32 to vector<8x16xi32>
    %11 = arith.cmpi sge, %3, %10 : vector<8x16xi32>
    %12 = arith.ori %9, %11 : vector<8x16xi1>
    %c0_3 = arith.constant 0 : index
    %c0_4 = arith.constant 0 : index
    %13 = vector.load %arg1[%c0_3, %c0_4] : memref<16x128xf32, #tpu.memory_space<vmem>>, vector<16x128xf32>
    %14 = tpu.assume_multiple %1, 8 : i32
    %15 = arith.index_cast %14 : i32 to index
    %c0_5 = arith.constant 0 : index
    %16 = vector.load %arg1[%15, %c0_5] : memref<16x128xf32, #tpu.memory_space<vmem>>, vector<8x128xf32>
    %cst = arith.constant dense<0.000000e+00> : vector<8x16xf32>
    %17 = tpu.matmul %16, %13, %cst {dimension_numbers = #tpu.dot_dimension_numbers<[1], [1], [0], [0], [0, 0, 1, 0], [], []>} : vector<8x128xf32>, vector<16x128xf32>, vector<8x16xf32> -> vector<8x16xf32>
    %18 = vector.broadcast %1 : i32 to vector<8x16xi32>
    %19 = arith.addi %4, %18 : vector<8x16xi32>
    %20 = arith.cmpi eq, %3, %19 : vector<8x16xi32>
    %21 = arith.ori %20, %12 : vector<8x16xi1>
    %cst_6 = arith.constant -1.000000e+30 : f32
    %22 = vector.broadcast %cst_6 : f32 to vector<8x16xf32>
    %23 = arith.select %21, %22, %17 : vector<8x16xi1>, vector<8x16xf32>
    %24 = math.exp %23 : vector<8x16xf32>
    %cst_7 = arith.constant dense<0.000000e+00> : vector<8xf32>
    %25 = vector.multi_reduction <add>, %24, %cst_7 [1] : vector<8x16xf32> to vector<8xf32>
    %26 = vector.shape_cast %25 : vector<8xf32> to vector<8x1xf32>
    %27 = math.log %26 : vector<8x1xf32>
    %c8_i32_8 = arith.constant 8 : i32
    %28 = arith.addi %c8_i32_8, %1 : i32
    %c8_i32_9 = arith.constant 8 : i32
    %29 = arith.addi %c8_i32_9, %1 : i32
    %30 = tpu.assume_multiple %28, 8 : i32
    %31 = arith.index_cast %30 : i32 to index
    %c0_10 = arith.constant 0 : index
    %32 = vector.load %arg1[%31, %c0_10] : memref<16x128xf32, #tpu.memory_space<vmem>>, vector<8x128xf32>
    %cst_11 = arith.constant dense<0.000000e+00> : vector<8x16xf32>
    %33 = tpu.matmul %32, %13, %cst_11 {dimension_numbers = #tpu.dot_dimension_numbers<[1], [1], [0], [0], [0, 0, 1, 0], [], []>} : vector<8x128xf32>, vector<16x128xf32>, vector<8x16xf32> -> vector<8x16xf32>
    %34 = vector.broadcast %29 : i32 to vector<8x16xi32>
    %35 = arith.addi %4, %34 : vector<8x16xi32>
    %36 = arith.cmpi eq, %3, %35 : vector<8x16xi32>
    %37 = arith.ori %36, %12 : vector<8x16xi1>
    %cst_12 = arith.constant -1.000000e+30 : f32
    %38 = vector.broadcast %cst_12 : f32 to vector<8x16xf32>
    %39 = arith.select %37, %38, %33 : vector<8x16xi1>, vector<8x16xf32>
    %40 = math.exp %39 : vector<8x16xf32>
    %cst_13 = arith.constant dense<0.000000e+00> : vector<8xf32>
    %41 = vector.multi_reduction <add>, %40, %cst_13 [1] : vector<8x16xf32> to vector<8xf32>
    %42 = vector.shape_cast %41 : vector<8xf32> to vector<8x1xf32>
    %43 = math.log %42 : vector<8x1xf32>
    %44 = tpu.iota {dimensions = array<i32: 0>} : vector<8x1xi32>
    %45 = vector.broadcast %1 : i32 to vector<8x1xi32>
    %46 = arith.addi %44, %45 : vector<8x1xi32>
    %c8_i32_14 = arith.constant 8 : i32
    %47 = vector.broadcast %c8_i32_14 : i32 to vector<8x1xi32>
    %48 = arith.cmpi slt, %46, %47 : vector<8x1xi32>
    %49 = arith.extui %48 : vector<8x1xi1> to vector<8x1xi32>
    %50 = arith.sitofp %49 : vector<8x1xi32> to vector<8x1xf32>
    %51 = arith.addf %27, %43 : vector<8x1xf32>
    %cst_15 = arith.constant 2.000000e+00 : f32
    %52 = vector.broadcast %cst_15 : f32 to vector<8x1xf32>
    %53 = arith.mulf %52, %2 : vector<8x1xf32>
    %54 = arith.subf %51, %53 : vector<8x1xf32>
    %55 = arith.mulf %50, %54 : vector<8x1xf32>
    %56 = vector.shape_cast %55 : vector<8x1xf32> to vector<1x8x1xf32>
    %cst_16 = arith.constant dense<0.000000e+00> : vector<1xf32>
    %57 = vector.multi_reduction <add>, %56, %cst_16 [1, 2] : vector<1x8x1xf32> to vector<1xf32>
    %58 = vector.shape_cast %57 : vector<1xf32> to vector<1x1x1xf32>
    %59 = vector.extract %58[0, 0, 0] : f32 from vector<1x1x1xf32>
    %60 = tpu.iota {dimensions = array<i32: 0>} : vector<8x128xi32>
    %61 = tpu.iota {dimensions = array<i32: 1>} : vector<8x128xi32>
    %c0_i32 = arith.constant 0 : i32
    %62 = vector.broadcast %c0_i32 : i32 to vector<8x128xi32>
    %63 = arith.cmpi eq, %60, %62 : vector<8x128xi32>
    %c0_i32_17 = arith.constant 0 : i32
    %64 = vector.broadcast %c0_i32_17 : i32 to vector<8x128xi32>
    %65 = arith.cmpi eq, %61, %64 : vector<8x128xi32>
    %66 = arith.andi %63, %65 : vector<8x128xi1>
    %cst_18 = arith.constant 0.000000e+00 : f32
    %67 = vector.broadcast %59 : f32 to vector<8x128xf32>
    %68 = vector.broadcast %cst_18 : f32 to vector<8x128xf32>
    %69 = arith.select %66, %67, %68 : vector<8x128xi1>, vector<8x128xf32>
    %c0_19 = arith.constant 0 : index
    %c0_20 = arith.constant 0 : index
    %70 = vector.load %arg3[%c0_19, %c0_20] : memref<8x128xf32, #tpu.memory_space<vmem>>, vector<8x128xf32>
    tpu.vector_store %arg3[%c0_19, %c0_20], %69 {strides = array<i32>} : memref<8x128xf32, #tpu.memory_space<vmem>>, vector<8x128xf32>,
    return
  }
  func.func @transform_0(%arg0: i32) -> (i32, i32) {
    %c0_i32 = arith.constant 0 : i32
    %c0_i32_0 = arith.constant 0 : i32
    %c0_i32_1 = arith.constant 0 : i32
    return %c0_i32, %c0_i32_0 : i32, i32
  }
  func.func @transform_1(%arg0: i32) -> (i32, i32) {
    %c0_i32 = arith.constant 0 : i32
    %c0_i32_0 = arith.constant 0 : i32
    return %arg0, %c0_i32 : i32, i32
  }
  func.func @transform_2(%arg0: i32) -> (i32, i32) {
    %c0_i32 = arith.constant 0 : i32
    %c0_i32_0 = arith.constant 0 : i32
    return %arg0, %c0_i32 : i32, i32
  }
}

</mosaic_0001>

<bundles_post_ra>
// kernel: tpu_custom_call.1
= control target key start
LH: loop header
LB: loop body
LE: loop exit
PB: predicated region body
PF: predicated region fallthrough
CT: control target
= control target key end

     0   :  { %7 = vsyncpa [#allocation3], 0  ;;  %s389_s0 = inlined_call_operand.hbm [shape: f32[16,128], index: 0, kind: input, shape index: {}]   ;;  %s390_s1 = inlined_call_operand.vmem [shape: f32[8,1], index: 1, kind: input, shape index: {}]   ;;  %s391_s2 = inlined_call_operand.hbm [shape: f32[8,128], index: 2, kind: output, shape index: {}]  }
   0x1   :  { %8 = vsyncpa [#allocation4], 0  ;;  %s340_s9 = smov [#allocation2]   ;;  %s292_s13 = scalar_lea.hbm %s389_s0, 256 }
   0x2   :  { %s14_s10 = sshll.u32 %s340_s9, 4  ;;  %p293_p0 = scmp.ne.s32.totalorder %s389_s0, %s292_s13  ;;  %s15_s10 = int_to_ptr.vmem [resolvable:$true] %s14_s10 }
   0x3   :  { %p296_p1 = scmp.lt.u32.totalorder %s292_s13, %s389_s0 }
   0x5   :  { %p298_p2 = pnand %p296_p1, %p293_p0 }
   0x7   :  { %301 = shalt.err (!%p298_p2)
}
   0x8   :  { %s302_s18 = scalar_lea.vmem %s15_s10, 256  ;;  %p307_p4 = scmp.lt.s32.totalorder %s15_s10, %s15_s10 }
   0x9   :  { %p303_p3 = scmp.ne.s32.totalorder %s15_s10, %s302_s18  ;;  %p308_p5 = scmp.lt.s32.totalorder %s302_s18, %s302_s18 }
   0xb   :  { %p309_p6 = por %p308_p5, %p307_p4 }
   0xd   :  { %p310_p7 = pnand %p309_p6, %p303_p3 }
   0xf   :  { %313 = shalt.err (!%p310_p7)
}
  0x10   :  { %s341_s19 = smov 128   ;;  %s342_s20 = smov 8  }
  0x11   :  { %20 = dma.hbm_to_vmem [thread:$0]  %s389_s0, 256, %s15_s10, [#allocation3], %s341_s19, %s341_s19, %s342_s20  }
  0x12   :  { %336 = dma.done.wait [#allocation3], 256  }
  0x13   :  { %337 = vsyncadd [#allocation3], 4294967040  ;;  %v343_v0 = vmov 0.0|0.0   ;;  %vm344_vm0 = vmmov 0   ;;  %v345_v1 = vmov 0.0   ;;  %v37_v2 = vld [vmem:[#allocation2] sm:$0xff]  ;;  %v28_v5 = vlaneseq }
  0x14   :  { %269 = vmatprep.subr.bf16.mxu0 %v343_v0  ;;  %272 = vmatprep.subr.bf16.mxu1 %v343_v0  ;;  %v38_v3 = vld [vmem:[#allocation2 + $0x8] sm:$0xff]  ;;  %vm118_vm10 = vcmask 130048   ;;  %v27_v24 = vld [vmem:[%s390_s1] sm:$0xff]  ;;  %vm216_vm11 = vcmask 7168   ;;  %s346_s1 = smov [#allocation5]  }
  0x15   :  { %259 = vmatprep.mubr.msk.f32.mxu0 %vm344_vm0, %v345_v1  ;;  %266 = vmatprep.mubr.msk.f32.mxu1 %vm344_vm0, %v345_v1  ;;  %v270_v4 = vpack.c.bf16 %v38_v3, %v37_v2  ;;  %v29_v6 = vand.u32 127, %v28_v5  ;;  %v31_v7 = vshrl.u32 %v28_v5, 7  ;;  %v213_v28 = vmul.f32 2.0, %v27_v24  ;;  %s239_s24 = sshll.u32 %s346_s1, 4  ;;  %s240_s24 = int_to_ptr.vmem [resolvable:$true] %s239_s24 }
  0x16   :  { %s314_s26 = scalar_lea.vmem %s240_s24, 128  ;;  %p319_p9 = scmp.lt.s32.totalorder %s240_s24, %s240_s24 }
  0x17   :  { %271 = vmatpush3.bf16.xpose.msra.mxu0 %v270_v4  ;;  %274 = vmatpush3.bf16.xpose.msra.mxu1 %v270_v4  ;;  %vm32_vm1 = vcmp.ge.s32.totalorder %v29_v6, 8  ;;  %vm33_vm2 = vcmp.lt.s32.totalorder %v29_v6, 8  ;;  %vm35_vm4 = vcmp.ge.s32.totalorder %v29_v6, 16  ;;  %v198_v8 = vadd.s32 8, %v31_v7  ;;  %p315_p8 = scmp.ne.s32.totalorder %s240_s24, %s314_s26  ;;  %p320_p10 = scmp.lt.s32.totalorder %s314_s26, %s314_s26 }
  0x18   :  { %vm34_vm3 = vmand %vm32_vm1, %vm33_vm2  ;;  %vm113_vm6 = vcmp.eq.s32.totalorder %v29_v6, %v31_v7  ;;  %vm227_vm12 = vcmp.eq.s32.totalorder %v31_v7, 0  ;;  %vm228_vm13 = vcmp.eq.s32.totalorder %v29_v6, 0 }
  0x19   :  { %vm36_vm5 = vmor %vm34_vm3, %vm35_vm4  ;;  %vm199_vm7 = vcmp.eq.s32.totalorder %v29_v6, %v198_v8  ;;  %p321_p11 = por %p320_p10, %p319_p9 }
  0x1a   :  { %vm114_vm8 = vmor %vm113_vm6, %vm36_vm5 }
  0x1b   :  { %vm200_vm9 = vmor %vm199_vm7, %vm36_vm5  ;;  %p322_p12 = pnand %p321_p11, %p315_p8 }
  0x1c   :  { %vm229_vm14 = vmand %vm227_vm12, %vm228_vm13 }
  0x1e   :  { %260 = vmatmul.mubr.f32.vlgmr.msra.gmra.mrb[0].mxu0 %v37_v2  ;;  %267 = vmatmul.mubr.f32.vlgmr.msra.gmra.mrb[0].mxu1 %v38_v3 }
  0xf1   :  { %v107_v9 = vpop.f32.mrb[0].mxu0  ;;  %v193_v10 = vpop.f32.mrb[0].mxu1 }
  0xf2   :  { %v115_v11 = vsel %vm114_vm8, -1e+30, %v107_v9  ;;  %v261_v12 = vpop.f32.mrb[1].mxu0  ;;  %v201_v13 = vsel %vm200_vm9, -1e+30, %v193_v10  ;;  %v268_v14 = vpop.f32.mrb[1].mxu1 }
  0xf3   :  { %v116_v15 = vmul.f32 1.442695, %v115_v11  ;;  %v202_v16 = vmul.f32 1.442695, %v201_v13 }
  0xf5   :  { %284 = vpow2.f32 %v116_v15 }
  0xf6   :  { %286 = vpow2.f32 %v202_v16 }
  0xff   :  { %v285_v17 = vpop.eup %284 }
 0x100   :  { %v287_v18 = vpop.eup %286  ;;  %v119_v19 = vsel %vm118_vm10, %v285_v17, 0.0 }
 0x101   :  { %120 = vadd.xlane.f32.xlu0 %v119_v19  ;;  %v204_v20 = vsel %vm118_vm10, %v287_v18, 0.0 }
 0x105   :  { %205 = vadd.xlane.f32.xlu0 %v204_v20 }
 0x18e   :  { %v121_v21 = vpop.xlane.xlu0 %120 }
 0x18f   :  { %288 = vlog2.f32 %v121_v21 }
 0x192   :  { %v206_v22 = vpop.xlane.xlu0 %205 }
 0x193   :  { %290 = vlog2.f32 %v206_v22 }
 0x199   :  { %v289_v23 = vpop.eup %288 }
 0x19a   :  { %v123_v26 = vmul.f32 0.6931472, %v289_v23 }
 0x19d   :  { %v291_v25 = vpop.eup %290 }
 0x19e   :  { %v208_v27 = vmul.f32 0.6931472, %v291_v25 }
 0x1a0   :  { %v212_v29 = vadd.f32 %v208_v27, %v123_v26 }
 0x1a2   :  { %v214_v30 = vsub.f32 %v212_v29, %v213_v28 }
 0x1a4   :  { %v217_v31 = vsel %vm216_vm11, %v214_v30, 0.0 }
 0x1a5   :  { %218 = vadd.xlane.f32.xlu1 %v217_v31 }
 0x232   :  { %v219_v32 = vpop.xlane.xlu1 %218 }
 0x233   :  { %v220_v33 = vrot.slane %v219_v32, 4 }
 0x235   :  { %v221_v34 = vadd.f32 %v220_v33, %v219_v32 }
 0x237   :  { %v222_v35 = vrot.slane %v221_v34, 2 }
 0x239   :  { %v223_v36 = vadd.f32 %v222_v35, %v221_v34 }
 0x23b   :  { %v224_v37 = vrot.slane %v223_v36, 1 }
 0x23d   :  { %v225_v38 = vadd.f32 %v224_v37, %v223_v36 }
 0x23f   :  { %275 = vpush %v225_v38 }
 0x270   :  { %s276_s25 = spop %275 }
 0x271   :  { %v230_v39 = vstv %s276_s25 }
 0x272   :  { %v231_v40 = vsel %vm229_vm14, %v230_v39, 0.0 }
 0x273   :  { %232 = vst [vmem:[#allocation5] sm:$0xff] %v231_v40 }
 0x274   :  { %325 = shalt.err (!%p322_p12)
}
 0x275   :  { %s326_s29 = scalar_lea.hbm %s391_s2, 128 }
 0x276   :  { %p327_p13 = scmp.ne.s32.totalorder %s391_s2, %s326_s29  ;;  %p330_p0 = scmp.lt.u32.totalorder %s326_s29, %s391_s2 }
 0x278   :  { %p332_p1 = pnand %p330_p0, %p327_p13 }
 0x27a   :  { %335 = shalt.err (!%p332_p1)
}
 0x27b   :  { %242 = dma.vmem_to_hbm [thread:$0]  %s240_s24, 128, %s391_s2, [#allocation4]  }
 0x27c   :  { %338 = dma.done.wait [#allocation4], 128  }
 0x27d   :  { %339 = vsyncadd [#allocation4], 4294967168 }
 0x27e   :  { %246 = vsyncpa [#allocation3], 1 }
 0x27f   :  { %247 = vsyncpa [#allocation4], 1 }

// kernel: tpu_custom_call.1
= control target key start
LH: loop header
LB: loop body
LE: loop exit
PB: predicated region body
PF: predicated region fallthrough
CT: control target
= control target key end

     0   :  { %7 = vsyncpa [#allocation3], 0  ;;  %s389_s0 = inlined_call_operand.hbm [shape: f32[16,128], index: 0, kind: input, shape index: {}]   ;;  %s390_s1 = inlined_call_operand.vmem [shape: f32[8,1], index: 1, kind: input, shape index: {}]   ;;  %s391_s2 = inlined_call_operand.hbm [shape: f32[8,128], index: 2, kind: output, shape index: {}]  }
   0x1   :  { %8 = vsyncpa [#allocation4], 0  ;;  %s340_s9 = smov [#allocation2]   ;;  %s292_s13 = scalar_lea.hbm %s389_s0, 256 }
   0x2   :  { %s14_s10 = sshll.u32 %s340_s9, 4  ;;  %p293_p0 = scmp.ne.s32.totalorder %s389_s0, %s292_s13  ;;  %s15_s10 = int_to_ptr.vmem [resolvable:$true] %s14_s10 }
   0x3   :  { %p296_p1 = scmp.lt.u32.totalorder %s292_s13, %s389_s0 }
   0x5   :  { %p298_p2 = pnand %p296_p1, %p293_p0 }
   0x7   :  { %301 = shalt.err (!%p298_p2)
}
   0x8   :  { %s302_s18 = scalar_lea.vmem %s15_s10, 256  ;;  %p307_p4 = scmp.lt.s32.totalorder %s15_s10, %s15_s10 }
   0x9   :  { %p303_p3 = scmp.ne.s32.totalorder %s15_s10, %s302_s18  ;;  %p308_p5 = scmp.lt.s32.totalorder %s302_s18, %s302_s18 }
   0xb   :  { %p309_p6 = por %p308_p5, %p307_p4 }
   0xd   :  { %p310_p7 = pnand %p309_p6, %p303_p3 }
   0xf   :  { %313 = shalt.err (!%p310_p7)
}
  0x10   :  { %s341_s19 = smov 128   ;;  %s342_s20 = smov 8  }
  0x11   :  { %20 = dma.hbm_to_vmem [thread:$0]  %s389_s0, 256, %s15_s10, [#allocation3], %s341_s19, %s341_s19, %s342_s20  }
  0x12   :  { %336 = dma.done.wait [#allocation3], 256  }
  0x13   :  { %337 = vsyncadd [#allocation3], 4294967040  ;;  %v343_v0 = vmov 0.0|0.0   ;;  %vm344_vm0 = vmmov 0   ;;  %v345_v1 = vmov 0.0   ;;  %v37_v2 = vld [vmem:[#allocation2] sm:$0xff]  ;;  %v28_v5 = vlaneseq }
  0x14   :  { %269 = vmatprep.subr.bf16.mxu0 %v343_v0  ;;  %272 = vmatprep.subr.bf16.mxu1 %v343_v0  ;;  %v38_v3 = vld [vmem:[#allocation2 + $0x8] sm:$0xff]  ;;  %vm118_vm10 = vcmask 130048   ;;  %v27_v24 = vld [vmem:[%s390_s1] sm:$0xff]  ;;  %vm216_vm11 = vcmask 7168   ;;  %s346_s1 = smov [#allocation5]  }
  0x15   :  { %259 = vmatprep.mubr.msk.f32.mxu0 %vm344_vm0, %v345_v1  ;;  %266 = vmatprep.mubr.msk.f32.mxu1 %vm344_vm0, %v345_v1  ;;  %v270_v4 = vpack.c.bf16 %v38_v3, %v37_v2  ;;  %v29_v6 = vand.u32 127, %v28_v5  ;;  %v31_v7 = vshrl.u32 %v28_v5, 7  ;;  %v213_v28 = vmul.f32 2.0, %v27_v24  ;;  %s239_s24 = sshll.u32 %s346_s1, 4  ;;  %s240_s24 = int_to_ptr.vmem [resolvable:$true] %s239_s24 }
  0x16   :  { %s314_s26 = scalar_lea.vmem %s240_s24, 128  ;;  %p319_p9 = scmp.lt.s32.totalorder %s240_s24, %s240_s24 }
  0x17   :  { %271 = vmatpush3.bf16.xpose.msra.mxu0 %v270_v4  ;;  %274 = vmatpush3.bf16.xpose.msra.mxu1 %v270_v4  ;;  %vm32_vm1 = vcmp.ge.s32.totalorder %v29_v6, 8  ;;  %vm33_vm2 = vcmp.lt.s32.totalorder %v29_v6, 8  ;;  %vm35_vm4 = vcmp.ge.s32.totalorder %v29_v6, 16  ;;  %v198_v8 = vadd.s32 8, %v31_v7  ;;  %p315_p8 = scmp.ne.s32.totalorder %s240_s24, %s314_s26  ;;  %p320_p10 = scmp.lt.s32.totalorder %s314_s26, %s314_s26 }
  0x18   :  { %vm34_vm3 = vmand %vm32_vm1, %vm33_vm2  ;;  %vm113_vm6 = vcmp.eq.s32.totalorder %v29_v6, %v31_v7  ;;  %vm227_vm12 = vcmp.eq.s32.totalorder %v31_v7, 0  ;;  %vm228_vm13 = vcmp.eq.s32.totalorder %v29_v6, 0 }
  0x19   :  { %vm36_vm5 = vmor %vm34_vm3, %vm35_vm4  ;;  %vm199_vm7 = vcmp.eq.s32.totalorder %v29_v6, %v198_v8  ;;  %p321_p11 = por %p320_p10, %p319_p9 }
  0x1a   :  { %vm114_vm8 = vmor %vm113_vm6, %vm36_vm5 }
  0x1b   :  { %vm200_vm9 = vmor %vm199_vm7, %vm36_vm5  ;;  %p322_p12 = pnand %p321_p11, %p315_p8 }
  0x1c   :  { %vm229_vm14 = vmand %vm227_vm12, %vm228_vm13 }
  0x1e   :  { %260 = vmatmul.mubr.f32.vlgmr.msra.gmra.mrb[0].mxu0 %v37_v2  ;;  %267 = vmatmul.mubr.f32.vlgmr.msra.gmra.mrb[0].mxu1 %v38_v3 }
  0xf1   :  { %v107_v9 = vpop.f32.mrb[0].mxu0  ;;  %v193_v10 = vpop.f32.mrb[0].mxu1 }
  0xf2   :  { %v115_v11 = vsel %vm114_vm8, -1e+30, %v107_v9  ;;  %v261_v12 = vpop.f32.mrb[1].mxu0  ;;  %v201_v13 = vsel %vm200_vm9, -1e+30, %v193_v10  ;;  %v268_v14 = vpop.f32.mrb[1].mxu1 }
  0xf3   :  { %v116_v15 = vmul.f32 1.442695, %v115_v11  ;;  %v202_v16 = vmul.f32 1.442695, %v201_v13 }
  0xf5   :  { %284 = vpow2.f32 %v116_v15 }
  0xf6   :  { %286 = vpow2.f32 %v202_v16 }
  0xff   :  { %v285_v17 = vpop.eup %284 }
 0x100   :  { %v287_v18 = vpop.eup %286  ;;  %v119_v19 = vsel %vm118_vm10, %v285_v17, 0.0 }
 0x101   :  { %120 = vadd.xlane.f32.xlu0 %v119_v19  ;;  %v204_v20 = vsel %vm118_vm10, %v287_v18, 0.0 }
 0x105   :  { %205 = vadd.xlane.f32.xlu0 %v204_v20 }
 0x18e   :  { %v121_v21 = vpop.xlane.xlu0 %120 }
 0x18f   :  { %288 = vlog2.f32 %v121_v21 }
 0x192   :  { %v206_v22 = vpop.xlane.xlu0 %205 }
 0x193   :  { %290 = vlog2.f32 %v206_v22 }
 0x199   :  { %v289_v23 = vpop.eup %288 }
 0x19a   :  { %v123_v26 = vmul.f32 0.6931472, %v289_v23 }
 0x19d   :  { %v291_v25 = vpop.eup %290 }
 0x19e   :  { %v208_v27 = vmul.f32 0.6931472, %v291_v25 }
 0x1a0   :  { %v212_v29 = vadd.f32 %v208_v27, %v123_v26 }
 0x1a2   :  { %v214_v30 = vsub.f32 %v212_v29, %v213_v28 }
 0x1a4   :  { %v217_v31 = vsel %vm216_vm11, %v214_v30, 0.0 }
 0x1a5   :  { %218 = vadd.xlane.f32.xlu1 %v217_v31 }
 0x232   :  { %v219_v32 = vpop.xlane.xlu1 %218 }
 0x233   :  { %v220_v33 = vrot.slane %v219_v32, 4 }
 0x235   :  { %v221_v34 = vadd.f32 %v220_v33, %v219_v32 }
 0x237   :  { %v222_v35 = vrot.slane %v221_v34, 2 }
 0x239   :  { %v223_v36 = vadd.f32 %v222_v35, %v221_v34 }
 0x23b   :  { %v224_v37 = vrot.slane %v223_v36, 1 }
 0x23d   :  { %v225_v38 = vadd.f32 %v224_v37, %v223_v36 }
 0x23f   :  { %275 = vpush %v225_v38 }
 0x270   :  { %s276_s25 = spop %275 }
 0x271   :  { %v230_v39 = vstv %s276_s25 }
 0x272   :  { %v231_v40 = vsel %vm229_vm14, %v230_v39, 0.0 }
 0x273   :  { %232 = vst [vmem:[#allocation5] sm:$0xff] %v231_v40 }
 0x274   :  { %325 = shalt.err (!%p322_p12)
}
 0x275   :  { %s326_s29 = scalar_lea.hbm %s391_s2, 128 }
 0x276   :  { %p327_p13 = scmp.ne.s32.totalorder %s391_s2, %s326_s29  ;;  %p330_p0 = scmp.lt.u32.totalorder %s326_s29, %s391_s2 }
 0x278   :  { %p332_p1 = pnand %p330_p0, %p327_p13 }
 0x27a   :  { %335 = shalt.err (!%p332_p1)
}
 0x27b   :  { %242 = dma.vmem_to_hbm [thread:$0]  %s240_s24, 128, %s391_s2, [#allocation4]  }
 0x27c   :  { %338 = dma.done.wait [#allocation4], 128  }
 0x27d   :  { %339 = vsyncadd [#allocation4], 4294967168 }
 0x27e   :  { %246 = vsyncpa [#allocation3], 1 }
 0x27f   :  { %247 = vsyncpa [#allocation4], 1 }

</bundles_post_ra>
